<compile_context>
chip_gen: v7x
topology: tpu7x:2x2x1
jax: 0.10.0
libtpu: 0.0.40
codegen_flags: <defaults>
</compile_context>

<pallas_src>
import functools

import jax
import jax.numpy as jnp
from jax.experimental import pallas as pl
from jax.experimental.pallas import tpu as pltpu

DROPOUT_P = 0.2
# Keep an element iff its uniform int32 hash >= this threshold:
#   P(h >= T) = (2^31 - T) / 2^32 = 1 - p     (h uniform over [-2^31, 2^31))
_KEEP_THRESHOLD = int(round(DROPOUT_P * (1 << 32))) - (1 << 31)   # == -1288490189

# murmur3 fmix32 constants as signed int32 literals.
_MIX_GOLDEN = -1640531535   # 0x9E3779B1
_MIX_A = -2048144789        # 0x85EBCA6B
_MIX_B = -1028477387        # 0xC2B2AE35


def _shr_logical(h, n):
    """Logical right shift of an int32 array (arithmetic shift + mask)."""
    mask = jnp.int32((1 << (32 - n)) - 1)
    return jnp.bitwise_and(jnp.right_shift(h, n), mask)


def _hash_bits_i32(shape, seed):
    """Per-element pseudo-random int32 bits: murmur3 fmix32 over a linear index.

    Uses only plain jnp int32 ops (mul/add/xor/shift) so it lowers on both the
    Mosaic TPU backend and the CPU interpreter.  `shape` must be 2-D.
    """
    rows = jax.lax.broadcasted_iota(jnp.int32, shape, 0)
    cols = jax.lax.broadcasted_iota(jnp.int32, shape, 1)
    h = rows * jnp.int32(shape[1]) + cols
    h = h * jnp.int32(_MIX_GOLDEN) + seed
    h = h ^ _shr_logical(h, 16)
    h = h * jnp.int32(_MIX_A)
    h = h ^ _shr_logical(h, 13)
    h = h * jnp.int32(_MIX_B)
    h = h ^ _shr_logical(h, 16)
    return h


def net_kernel(seed_ref, x_ref, w1_ref, b1_ref, w2_ref, b2_ref, w3_ref, b3_ref,
               o_ref, *, training: bool):
    x = x_ref[...]

    if training:
        # Dropout(p=0.2): integer-domain threshold on hashed bits (no float
        # convert).  The 1/(1-p) rescale is folded into w1t at init time, so
        # only the zeroing happens here.
        bits = _hash_bits_i32(x.shape, seed_ref[0])
        x = jnp.where(bits >= _KEEP_THRESHOLD, x, 0.0)

    # lin1: (B, in) @ (in, 4H) + b1   -- MXU
    h1 = jnp.dot(x, w1_ref[...], preferred_element_type=jnp.float32) + b1_ref[...]
    # lin2: (B, 4H) @ (4H, H) + b2    -- MXU
    h2 = jnp.dot(h1, w2_ref[...], preferred_element_type=jnp.float32) + b2_ref[...]
    # lin3: out_features == 1.  A (B,H)@(H,1) matmul would use a single MXU
    # output column and pay the full MXU push/pop latency; do it on the VPU/XLU
    # instead: elementwise multiply by the weight row + lane reduction.
    h3 = jnp.sum(h2 * w3_ref[...], axis=-1, keepdims=True) + b3_ref[...]

    o_ref[...] = jax.nn.sigmoid(h3)


def net_forward(seed, x, w1t, b1, w2t, b2, w3, b3, *, training: bool = True):
    """seed: (1,) int32; x: (batch, in); w1t/w2t transposed to (in, out);
    w3: (1, hidden) row of the lin3 weight; biases broadcastable (1, out)."""
    batch = x.shape[0]
    vmem = pl.BlockSpec(memory_space=pltpu.MemorySpace.VMEM)
    smem = pl.BlockSpec(memory_space=pltpu.MemorySpace.SMEM)
    kernel = functools.partial(net_kernel, training=training)
    # Single grid point: at these sizes (batch=8, 32->128->32->1) the kernel is
    # purely launch/latency bound; adding a grid would only add ~0.35 us/step.
    # TODO(synk): if batch grows to thousands, tile the batch axis with a grid +
    # BlockSpec ((TB, in), lambda i: (i, 0)), dimension_semantics=("parallel",)
    # (megacore on v7x), size TB against v7x's 64 MiB VMEM via vmem_limit_bytes,
    # cast matmul inputs to bf16 on v6e/v7x, and use a lane-dense output layout
    # instead of the (batch, 1) column.
    return pl.pallas_call(
        kernel,
        out_shape=jax.ShapeDtypeStruct((batch, 1), jnp.float32),
        in_specs=[smem, vmem, vmem, vmem, vmem, vmem, vmem, vmem],
        out_specs=vmem,
    )(seed, x, w1t, b1, w2t, b2, w3, b3)


def net_reference(seed, x, w1t, b1, w2t, b2, w3, b3, *, training: bool = True):
    """Pure-JAX reference with identical math (same hash-based dropout mask)."""
    if training:
        bits = _hash_bits_i32(x.shape, seed[0].astype(jnp.int32))
        x = jnp.where(bits >= _KEEP_THRESHOLD, x, 0.0)
    hi = jax.lax.Precision.HIGHEST
    h1 = jnp.dot(x, w1t, precision=hi) + b1
    h2 = jnp.dot(h1, w2t, precision=hi) + b2
    h3 = jnp.sum(h2 * w3, axis=-1, keepdims=True) + b3
    return jax.nn.sigmoid(h3)


def init_params(key, n_input, n_hidden_units, seq_len, *, training: bool = True):
    """Deterministic synthetic init mirroring Net.__init__ / init_weights."""
    in_features = n_input * seq_len
    h4 = n_hidden_units * 4
    h = n_hidden_units
    k1, k2, k3, k4, k5 = jax.random.split(key, 5)
    initrange = 0.5
    # Weights: uniform(-0.5, 0.5); lin1/lin2 stored transposed (in, out), lin3
    # kept as its natural (1, hidden) row (used as a broadcast multiplier).
    w1t = jax.random.uniform(k1, (in_features, h4), jnp.float32, -initrange, initrange)
    w2t = jax.random.uniform(k2, (h4, h), jnp.float32, -initrange, initrange)
    w3 = jax.random.uniform(k3, (1, h), jnp.float32, -initrange, initrange)
    if training:
        # Fold the training-mode dropout rescale 1/(1-p) into lin1's weight once
        # (offline), so the kernel only zeroes dropped activations:
        #   (x * 1/(1-p)) @ W == x @ (W * 1/(1-p))
        w1t = w1t * jnp.float32(1.0 / (1.0 - DROPOUT_P))
    # Biases: lin1/lin2 keep default nn.Linear init U(-1/sqrt(fan_in), +...);
    # lin3 bias is zeroed by init_weights.  Shaped (1, out) for broadcasting.
    b1 = jax.random.uniform(k4, (1, h4), jnp.float32,
                            -1.0 / float(in_features) ** 0.5,
                            1.0 / float(in_features) ** 0.5)
    b2 = jax.random.uniform(k5, (1, h), jnp.float32,
                            -1.0 / float(h4) ** 0.5, 1.0 / float(h4) ** 0.5)
    b3 = jnp.zeros((1, 1), jnp.float32)
    return w1t, b1, w2t, b2, w3, b3


if __name__ == "__main__":
    # Small shapes consistent with the module: n_input=4, seq_len=8 -> 32 input
    # features; n_hidden_units=32 -> lin1: 32->128, lin2: 128->32, lin3: 32->1.
    n_input, seq_len, n_hidden_units, batch = 4, 8, 32, 8

    key = jax.random.PRNGKey(0)
    kx, kp = jax.random.split(key)
    x = jax.random.normal(kx, (batch, n_input * seq_len), jnp.float32)
    params = init_params(kp, n_input, n_hidden_units, seq_len, training=True)

    seed = jnp.array([1234], dtype=jnp.int32)  # deterministic dropout seed

    out = net_forward(seed, x, *params, training=True)
    out = jax.block_until_ready(out)

    assert out.shape == (batch, 1)
    assert bool(jnp.all(jnp.isfinite(out)))
    assert bool(jnp.all((out >= 0.0) & (out <= 1.0)))  # sigmoid range

    # Sanity check against a pure-JAX reference using the identical dropout mask.
    ref = net_reference(seed, x, *params, training=True)
    assert bool(jnp.allclose(out, ref, atol=2e-3, rtol=0.0)), "kernel != reference"

    print("KERNEL_OK")
</pallas_src>

<mosaic_0001>
module attributes {stable_mosaic.version = 11 : i64} {
  func.func @net_kernel(%arg0: memref<1xi32, #tpu.memory_space<smem>>, %arg1: memref<8x32xf32, #tpu.memory_space<vmem>>, %arg2: memref<32x128xf32, #tpu.memory_space<vmem>>, %arg3: memref<1x128xf32, #tpu.memory_space<vmem>>, %arg4: memref<128x32xf32, #tpu.memory_space<vmem>>, %arg5: memref<1x32xf32, #tpu.memory_space<vmem>>, %arg6: memref<1x32xf32, #tpu.memory_space<vmem>>, %arg7: memref<1x1xf32, #tpu.memory_space<vmem>>, %arg8: memref<8x1xf32, #tpu.memory_space<vmem>>) attributes {dimension_semantics = [], scalar_prefetch = 0 : i64, scratch_operands = 0 : i64, tpu.core_type = #tpu.core_type<tc>} {
    %c0 = arith.constant 0 : index
    %c0_0 = arith.constant 0 : index
    %0 = vector.load %arg1[%c0, %c0_0] : memref<8x32xf32, #tpu.memory_space<vmem>>, vector<8x32xf32>
    %c0_1 = arith.constant 0 : index
    %1 = memref.load %arg0[%c0_1] : memref<1xi32, #tpu.memory_space<smem>>
    %2 = tpu.iota {dimensions = array<i32: 0>} : vector<8x32xi32>
    %3 = tpu.iota {dimensions = array<i32: 1>} : vector<8x32xi32>
    %c32_i32 = arith.constant 32 : i32
    %4 = vector.broadcast %c32_i32 : i32 to vector<8x32xi32>
    %5 = arith.muli %2, %4 : vector<8x32xi32>
    %6 = arith.addi %5, %3 : vector<8x32xi32>
    %c-1640531535_i32 = arith.constant -1640531535 : i32
    %7 = vector.broadcast %c-1640531535_i32 : i32 to vector<8x32xi32>
    %8 = arith.muli %6, %7 : vector<8x32xi32>
    %9 = vector.broadcast %1 : i32 to vector<8x32xi32>
    %10 = arith.addi %8, %9 : vector<8x32xi32>
    %c16_i32 = arith.constant 16 : i32
    %11 = vector.broadcast %c16_i32 : i32 to vector<8x32xi32>
    %12 = arith.shrsi %10, %11 : vector<8x32xi32>
    %c65535_i32 = arith.constant 65535 : i32
    %13 = vector.broadcast %c65535_i32 : i32 to vector<8x32xi32>
    %14 = arith.andi %12, %13 : vector<8x32xi32>
    %15 = arith.xori %10, %14 : vector<8x32xi32>
    %c-2048144789_i32 = arith.constant -2048144789 : i32
    %16 = vector.broadcast %c-2048144789_i32 : i32 to vector<8x32xi32>
    %17 = arith.muli %15, %16 : vector<8x32xi32>
    %c13_i32 = arith.constant 13 : i32
    %18 = vector.broadcast %c13_i32 : i32 to vector<8x32xi32>
    %19 = arith.shrsi %17, %18 : vector<8x32xi32>
    %c524287_i32 = arith.constant 524287 : i32
    %20 = vector.broadcast %c524287_i32 : i32 to vector<8x32xi32>
    %21 = arith.andi %19, %20 : vector<8x32xi32>
    %22 = arith.xori %17, %21 : vector<8x32xi32>
    %c-1028477387_i32 = arith.constant -1028477387 : i32
    %23 = vector.broadcast %c-1028477387_i32 : i32 to vector<8x32xi32>
    %24 = arith.muli %22, %23 : vector<8x32xi32>
    %c16_i32_2 = arith.constant 16 : i32
    %25 = vector.broadcast %c16_i32_2 : i32 to vector<8x32xi32>
    %26 = arith.shrsi %24, %25 : vector<8x32xi32>
    %c65535_i32_3 = arith.constant 65535 : i32
    %27 = vector.broadcast %c65535_i32_3 : i32 to vector<8x32xi32>
    %28 = arith.andi %26, %27 : vector<8x32xi32>
    %29 = arith.xori %24, %28 : vector<8x32xi32>
    %c-1288490189_i32 = arith.constant -1288490189 : i32
    %30 = vector.broadcast %c-1288490189_i32 : i32 to vector<8x32xi32>
    %31 = arith.cmpi sge, %29, %30 : vector<8x32xi32>
    %cst = arith.constant 0.000000e+00 : f32
    %32 = vector.broadcast %cst : f32 to vector<8x32xf32>
    %33 = arith.select %31, %0, %32 : vector<8x32xi1>, vector<8x32xf32>
    %c0_4 = arith.constant 0 : index
    %c0_5 = arith.constant 0 : index
    %34 = vector.load %arg2[%c0_4, %c0_5] : memref<32x128xf32, #tpu.memory_space<vmem>>, vector<32x128xf32>
    %cst_6 = arith.constant dense<0.000000e+00> : vector<8x128xf32>
    %35 = tpu.matmul %33, %34, %cst_6 {dimension_numbers = #tpu.dot_dimension_numbers<[1], [0], [0], [1], [0, 0, 1, 1], [], []>} : vector<8x32xf32>, vector<32x128xf32>, vector<8x128xf32> -> vector<8x128xf32>
    %c0_7 = arith.constant 0 : index
    %c0_8 = arith.constant 0 : index
    %36 = vector.load %arg3[%c0_7, %c0_8] : memref<1x128xf32, #tpu.memory_space<vmem>>, vector<1x128xf32>
    %37 = vector.broadcast %36 : vector<1x128xf32> to vector<8x128xf32>
    %38 = arith.addf %35, %37 : vector<8x128xf32>
    %c0_9 = arith.constant 0 : index
    %c0_10 = arith.constant 0 : index
    %39 = vector.load %arg4[%c0_9, %c0_10] : memref<128x32xf32, #tpu.memory_space<vmem>>, vector<128x32xf32>
    %cst_11 = arith.constant dense<0.000000e+00> : vector<8x32xf32>
    %40 = tpu.matmul %38, %39, %cst_11 {dimension_numbers = #tpu.dot_dimension_numbers<[1], [0], [0], [1], [0, 0, 1, 1], [], []>} : vector<8x128xf32>, vector<128x32xf32>, vector<8x32xf32> -> vector<8x32xf32>
    %c0_12 = arith.constant 0 : index
    %c0_13 = arith.constant 0 : index
    %41 = vector.load %arg5[%c0_12, %c0_13] : memref<1x32xf32, #tpu.memory_space<vmem>>, vector<1x32xf32>
    %42 = vector.broadcast %41 : vector<1x32xf32> to vector<8x32xf32>
    %43 = arith.addf %40, %42 : vector<8x32xf32>
    %c0_14 = arith.constant 0 : index
    %c0_15 = arith.constant 0 : index
    %44 = vector.load %arg6[%c0_14, %c0_15] : memref<1x32xf32, #tpu.memory_space<vmem>>, vector<1x32xf32>
    %45 = vector.broadcast %44 : vector<1x32xf32> to vector<8x32xf32>
    %46 = arith.mulf %43, %45 : vector<8x32xf32>
    %cst_16 = arith.constant dense<0.000000e+00> : vector<8xf32>
    %47 = vector.multi_reduction <add>, %46, %cst_16 [1] : vector<8x32xf32> to vector<8xf32>
    %48 = vector.shape_cast %47 : vector<8xf32> to vector<8x1xf32>
    %c0_17 = arith.constant 0 : index
    %c0_18 = arith.constant 0 : index
    %49 = vector.load %arg7[%c0_17, %c0_18] : memref<1x1xf32, #tpu.memory_space<vmem>>, vector<1x1xf32>
    %50 = vector.broadcast %49 : vector<1x1xf32> to vector<8x1xf32>
    %51 = arith.addf %48, %50 : vector<8x1xf32>
    %52 = arith.negf %51 : vector<8x1xf32>
    %53 = math.exp %52 : vector<8x1xf32>
    %cst_19 = arith.constant 1.000000e+00 : f32
    %54 = vector.broadcast %cst_19 : f32 to vector<8x1xf32>
    %55 = arith.addf %54, %53 : vector<8x1xf32>
    %56 = arith.divf %54, %55 : vector<8x1xf32>
    %c0_20 = arith.constant 0 : index
    %c0_21 = arith.constant 0 : index
    %57 = vector.load %arg8[%c0_20, %c0_21] : memref<8x1xf32, #tpu.memory_space<vmem>>, vector<8x1xf32>
    tpu.vector_store %arg8[%c0_20, %c0_21], %56 {strides = array<i32>} : memref<8x1xf32, #tpu.memory_space<vmem>>, vector<8x1xf32>,
    return
  }
}

</mosaic_0001>

<bundles_post_ra>
// kernel: tpu_custom_call.1
= control target key start
LH: loop header
LB: loop body
LE: loop exit
PB: predicated region body
PF: predicated region fallthrough
CT: control target
= control target key end

     0   :  { %v34_v0 = vlaneseq  ;;  %v379_v1 = vmov 0.0|0.0   ;;  %vm380_vm0 = vmmov 0   ;;  %v381_v5 = vmov 0.0   ;;  %s520_s2 = inlined_call_operand.vmem [shape: f32[32,128], index: 2, kind: input, shape index: {}]   ;;  %s521_s4 = inlined_call_operand.vmem [shape: f32[128,32], index: 4, kind: input, shape index: {}]   ;;  %s522_s0 = inlined_call_operand.<no memory space> [shape: s32[1], index: 0, kind: input, shape index: {}]   ;;  %s523_s1 = inlined_call_operand.vmem [shape: f32[8,32], index: 1, kind: input, shape index: {}]   ;;  %s524_s3 = inlined_call_operand.vmem [shape: f32[1,128], index: 3, kind: input, shape index: {}]   ;;  %s525_s7 = inlined_call_operand.<no memory space> [shape: f32[1,1], index: 7, kind: input, shape index: {}]   ;;  %s526_s5 = inlined_call_operand.vmem [shape: f32[1,32], index: 5, kind: input, shape index: {}]   ;;  %s527_s6 = inlined_call_operand.vmem [shape: f32[1,32], index: 6, kind: input, shape index: {}]   ;;  %s528_s8 = inlined_call_operand.vmem [shape: f32[8,1], index: 8, kind: output, shape index: {}]  }
   0x1   :  { %342 = vmatprep.subr.bf16.mxu0 %v379_v1  ;;  %v56_v2 = vld [vmem:[%s520_s2] sm:$0xff]  ;;  %v57_v3 = vld [vmem:[%s520_s2 + $0x8] sm:$0xff]  ;;  %v58_v4 = vld [vmem:[%s520_s2 + $0x10] sm:$0xff]  ;;  %304 = vmatprep.mubr.msk.f32.mxu0 %vm380_vm0, %v381_v5  ;;  %v41_v19 = vstv %s522_s0  ;;  %vm67_vm1 = vcmask 261120   ;;  %vm259_vm3 = vcmask 7168  }
   0x2   :  { %v343_v6 = vpack.c.bf16 %v57_v3, %v56_v2  ;;  %v59_v7 = vld [vmem:[%s520_s2 + $0x18] sm:$0xff]  ;;  %v35_v8 = vshrl.u32 %v34_v0, 7  ;;  %v37_v9 = vand.u32 127, %v34_v0  ;;  %348 = vmatprep.subr.bf16.mxu1 %v379_v1  ;;  %v141_v10 = vld [vmem:[%s521_s4] sm:$0xff]  ;;  %339 = vmatprep.mubr.msk.f32.mxu1 %vm380_vm0, %v381_v5  ;;  %v142_v11 = vld [vmem:[%s521_s4 + $0x8] sm:$0xff]  ;;  %v14_v54 = vstv %s525_s7 }
   0x3   :  { %v143_v12 = vld [vmem:[%s521_s4 + $0x10] sm:$0xff]  ;;  %v144_v13 = vld [vmem:[%s521_s4 + $0x18] sm:$0xff]  ;;  %v346_v14 = vpack.c.bf16 %v59_v7, %v58_v4  ;;  %v349_v16 = vpack.c.bf16 %v142_v11, %v141_v10  ;;  %v145_v20 = vld [vmem:[%s521_s4 + $0x20] sm:$0xff]  ;;  %15 = vst [vmem:[#allocation3] sm:$0x1] %v14_v54 }
   0x4   :  { %344 = vmatpush3.bf16.msra.mxu0 %v343_v6  ;;  %v38_v15 = vmul.u32 32, %v35_v8  ;;  %v352_v18 = vpack.c.bf16 %v144_v13, %v143_v12  ;;  %v146_v21 = vld [vmem:[%s521_s4 + $0x28] sm:$0xff]  ;;  %v147_v25 = vld [vmem:[%s521_s4 + $0x30] sm:$0xff]  ;;  %v148_v26 = vld [vmem:[%s521_s4 + $0x38] sm:$0xff] }
   0x5   :  { %345 = vmatprep.subr.bf16.mxu0 %v379_v1  ;;  %350 = vmatpush3.bf16.msra.mxu1 %v349_v16  ;;  %v355_v24 = vpack.c.bf16 %v146_v21, %v145_v20  ;;  %v358_v29 = vpack.c.bf16 %v148_v26, %v147_v25  ;;  %v149_v30 = vld [vmem:[%s521_s4 + $0x40] sm:$0xff]  ;;  %v150_v31 = vld [vmem:[%s521_s4 + $0x48] sm:$0xff]  ;;  %v151_v35 = vld [vmem:[%s521_s4 + $0x50] sm:$0xff] }
   0x6   :  { %v39_v17 = vadd.s32 %v38_v15, %v37_v9  ;;  %351 = vmatprep.subr.bf16.mxu1 %v379_v1  ;;  %v361_v34 = vpack.c.bf16 %v150_v31, %v149_v30  ;;  %v152_v36 = vld [vmem:[%s521_s4 + $0x58] sm:$0xff]  ;;  %v153_v40 = vld [vmem:[%s521_s4 + $0x60] sm:$0xff]  ;;  %v154_v41 = vld [vmem:[%s521_s4 + $0x68] sm:$0xff] }
   0x7   :  { %v364_v39 = vpack.c.bf16 %v152_v36, %v151_v35  ;;  %v32_v43 = vld [vmem:[%s523_s1] sm:$0xff]  ;;  %v367_v45 = vpack.c.bf16 %v154_v41, %v153_v40  ;;  %v155_v47 = vld [vmem:[%s521_s4 + $0x70] sm:$0xff]  ;;  %v156_v48 = vld [vmem:[%s521_s4 + $0x78] sm:$0xff] }
   0x8   :  { %347 = vmatpush3.bf16.msra.mxu0 %v346_v14  ;;  %v40_v22 = vmul.u32 2654435761, %v39_v17  ;;  %v370_v49 = vpack.c.bf16 %v156_v48, %v155_v47  ;;  %v268_v50 = vld [vmem:[%s524_s3] ss:$0 sm:$0xff] }
   0x9   :  { %353 = vmatpush3.bf16.msra.mxu1 %v352_v18  ;;  %v270_v55 = vld [vmem:[%s526_s5] ss:$0 sm:$0xff] }
   0xa   :  { %v42_v23 = vadd.s32 %v41_v19, %v40_v22  ;;  %354 = vmatprep.subr.bf16.mxu1 %v379_v1  ;;  %v271_v57 = vld [vmem:[%s527_s6] ss:$0 sm:$0xff] }
   0xb   :  { %v272_v62 = vld [vmem:[#allocation3] ss:$0 sm:$0xff] }
   0xc   :  { %v265_v27 = vshrl.u32 %v42_v23, 16 }
   0xd   :  { %356 = vmatpush3.bf16.msra.mxu1 %v355_v24 }
   0xe   :  { %v45_v28 = vxor.u32 %v265_v27, %v42_v23  ;;  %357 = vmatprep.subr.bf16.mxu1 %v379_v1 }
  0x10   :  { %v46_v32 = vmul.u32 2246822507, %v45_v28 }
  0x11   :  { %359 = vmatpush3.bf16.msra.mxu1 %v358_v29 }
  0x12   :  { %v266_v33 = vshrl.u32 %v46_v32, 13  ;;  %360 = vmatprep.subr.bf16.mxu1 %v379_v1 }
  0x14   :  { %v49_v37 = vxor.u32 %v266_v33, %v46_v32 }
  0x15   :  { %362 = vmatpush3.bf16.msra.mxu1 %v361_v34 }
  0x16   :  { %v50_v38 = vmul.u32 3266489909, %v49_v37  ;;  %363 = vmatprep.subr.bf16.mxu1 %v379_v1 }
  0x18   :  { %v267_v42 = vshrl.u32 %v50_v38, 16 }
  0x19   :  { %365 = vmatpush3.bf16.msra.mxu1 %v364_v39 }
  0x1a   :  { %v53_v44 = vxor.u32 %v267_v42, %v50_v38  ;;  %366 = vmatprep.subr.bf16.mxu1 %v379_v1 }
  0x1c   :  { %vm54_vm2 = vcmp.ge.s32.totalorder %v53_v44, 3006477107 }
  0x1d   :  { %v55_v46 = vsel %vm54_vm2, %v32_v43, 0.0  ;;  %368 = vmatpush3.bf16.msra.mxu1 %v367_v45 }
  0x1e   :  { %305 = vmatmul.mubr.msk.f32.vlgmr.msra.gmra.mrb[0].mxu0 %vm67_vm1, %v55_v46  ;;  %369 = vmatprep.subr.bf16.mxu1 %v379_v1 }
  0x21   :  { %371 = vmatpush3.bf16.msra.mxu1 %v370_v49 }
  0xf1   :  { %v137_v51 = vpop.f32.mrb[0].mxu0 }
  0xf2   :  { %v138_v52 = vadd.f32 %v268_v50, %v137_v51  ;;  %v306_v53 = vpop.f32.mrb[1].mxu0 }
  0xf4   :  { %340 = vmatmul.mubr.f32.vlgmr.msra.gmra.mrb[0].mxu1 %v138_v52 }
 0x1c7   :  { %v230_v56 = vpop.f32.mrb[0].mxu1 }
 0x1c8   :  { %v231_v58 = vadd.f32 %v270_v55, %v230_v56  ;;  %v341_v59 = vpop.f32.mrb[1].mxu1 }
 0x1ca   :  { %v241_v60 = vmul.f32 %v271_v57, %v231_v58 }
 0x1cc   :  { %v242_v61 = vsel %vm67_vm1, %v241_v60, 0.0 }
 0x1cd   :  { %243 = vadd.xlane.f32.xlu0 %v242_v61 }
 0x25a   :  { %v244_v63 = vpop.xlane.xlu0 %243 }
 0x25b   :  { %v252_v0 = vadd.f32 %v272_v62, %v244_v63 }
 0x25d   :  { %v273_v1 = vmul.f32 -1.442695, %v252_v0 }
 0x25f   :  { %375 = vpow2.f32 %v273_v1 }
 0x269   :  { %v376_v2 = vpop.eup %375 }
 0x26a   :  { %v256_v3 = vadd.f32 1.0, %v376_v2 }
 0x26c   :  { %377 = vrcp.f32 %v256_v3 }
 0x276   :  { %v378_v4 = vpop.eup %377 }
 0x277   :  { %260 = vst.msk [vmem:[%s528_s8] sm:$0xff] %vm259_vm3, %v378_v4 }

</bundles_post_ra>
